<compile_context>
chip_gen: v6e
topology: v6e:2x2x1
jax: 0.10.0
libtpu: 0.0.40
codegen_flags: <defaults>
</compile_context>

<pallas_src>
import jax
import jax.numpy as jnp
from jax import lax
from jax.experimental import pallas as pl
from jax.experimental.pallas import tpu as pltpu

DECAY = 0.25
LANES = 128


def _round_up(x, m):
    return ((x + m - 1) // m) * m


def _mem_update_kernel(x_ref, o_ref, carry_ref):
    # carry_ref holds (mem_{t-1} - spike_{t-1}) * DECAY; zero before t == 0.
    @pl.when(pl.program_id(1) == 0)
    def _():
        carry_ref[...] = jnp.zeros_like(carry_ref)

    tc = x_ref.shape[0]  # static time-chunk length

    def step(i, carry):
        mem = carry + x_ref[i].astype(jnp.float32)
        spike = jnp.round(jnp.clip(mem, 0.0, 4.0))  # MultiSpike4 (half-to-even, as torch.round)
        o_ref[i] = spike.astype(o_ref.dtype)
        return (mem - spike) * DECAY

    # Fully unrolled; carry stays in vregs, carry_ref touched once per grid step.
    carry_ref[...] = lax.fori_loop(0, tc, step, carry_ref[...], unroll=True)


def mem_update_forward(x, *, max_rows=1024, target_block_bytes=2 << 20,
                       max_time_chunk=32):
    """Pallas TPU forward of `mem_update` for x of shape (T, ...)."""
    orig_shape = x.shape
    orig_dtype = x.dtype
    itemsize = jnp.dtype(orig_dtype).itemsize
    T = orig_shape[0]
    M = 1
    for d in orig_shape[1:]:
        M *= d

    # Sublane packing alignment per dtype (f32: 8, bf16: 16, int8/fp8: 32).
    align = max(8, 32 // max(itemsize, 1))

    # Lane-dense packing: (T, M) -> (T, R, 128).  Pad only the ragged lane
    # tail (zero-copy when M is already a multiple of 128 - the common case).
    R = pl.cdiv(M, LANES)
    Mp = R * LANES
    xf = x.reshape(T, M)
    if Mp != M:
        # TODO(synk): fold the ragged lane tail into the kernel with a masked
        # store to avoid this extra wrapper-side HBM pass when it fires.
        xf = jnp.pad(xf, ((0, 0), (0, Mp - M)))
    x3 = xf.reshape(T, R, LANES)

    # --- Row tile -----------------------------------------------------------
    if R <= max_rows:
        tr = R  # full row extent: no alignment constraint, fully contiguous DMA
        # v7x megacore: ensure >= 2 row tiles if each half still moves >=256 KiB
        # per time step; otherwise rely on time-chunking and stay single-tile.
        half = _round_up(-(-R // 2), align)
        if half < R and half * LANES * itemsize >= (256 << 10):
            tr = half
    else:
        tr = (max_rows // align) * align  # aligned tile; last row tile may be partial

    # --- Time chunk ---------------------------------------------------------
    # Grow bytes-per-grid-step toward ~target_block_bytes; cap unroll length and
    # keep 2x(in)+2x(out)+carry comfortably under v5e's 16 MiB scoped default.
    bytes_per_t = tr * LANES * itemsize
    tc = int(max(1, min(T, max_time_chunk, target_block_bytes // bytes_per_t)))

    grid = (pl.cdiv(R, tr), pl.cdiv(T, tc))  # rows outer ("parallel"), time inner

    cost = pl.CostEstimate(
        flops=6 * T * M,
        transcendentals=0,
        bytes_accessed=2 * T * M * itemsize,
    )

    out = pl.pallas_call(
        _mem_update_kernel,
        out_shape=jax.ShapeDtypeStruct((T, R, LANES), orig_dtype),
        grid_spec=pltpu.PrefetchScalarGridSpec(
            num_scalar_prefetch=0,
            grid=grid,
            in_specs=[pl.BlockSpec((tc, tr, LANES), lambda r, t: (t, r, 0))],
            out_specs=pl.BlockSpec((tc, tr, LANES), lambda r, t: (t, r, 0)),
            scratch_shapes=[pltpu.VMEM((tr, LANES), jnp.float32)],
        ),
        compiler_params=pltpu.CompilerParams(
            dimension_semantics=("parallel", "arbitrary"),
        ),
        cost_estimate=cost,
    )(x3)

    out = out.reshape(T, Mp)
    if Mp != M:
        out = out[:, :M]
    return out.reshape(orig_shape)


def mem_update_reference(x):
    """Pure-JAX mirror of the PyTorch loop (for correctness checking)."""
    x32 = x.astype(jnp.float32)
    T = x.shape[0]
    spike = jnp.zeros_like(x32[0])
    mem_old = jnp.zeros_like(x32[0])
    outs = []
    for i in range(T):
        if i >= 1:
            mem = (mem_old - spike) * DECAY + x32[i]
        else:
            mem = x32[i]
        spike = jnp.round(jnp.clip(mem, 0.0, 4.0))
        mem_old = mem
        outs.append(spike)
    return jnp.stack(outs).astype(x.dtype)


if __name__ == "__main__":
    # Small shape consistent with the module's (T, B, C, H, W) usage.
    T, B, C, H, W = 4, 2, 8, 16, 16
    key = jax.random.PRNGKey(0)
    x = 3.0 * jax.random.normal(key, (T, B, C, H, W), jnp.float32)

    fwd = jax.jit(mem_update_forward)
    out = jax.block_until_ready(fwd(x))

    assert out.shape == (T, B, C, H, W)
    assert bool(jnp.all(jnp.isfinite(out)))
    ref = mem_update_reference(x)
    assert bool(jnp.allclose(out, ref)), float(jnp.max(jnp.abs(out - ref)))
    print("KERNEL_OK")
</pallas_src>

<mosaic_0001>
module attributes {stable_mosaic.version = 11 : i64} {
  func.func @_mem_update_kernel(%arg0: i32, %arg1: i32, %arg2: memref<4x32x128xf32, #tpu.memory_space<vmem>>, %arg3: memref<4x32x128xf32, #tpu.memory_space<vmem>>, %arg4: memref<32x128xf32, #tpu.memory_space<vmem>>) attributes {dimension_semantics = [#tpu.dimension_semantics<parallel>, #tpu.dimension_semantics<arbitrary>], iteration_bounds = array<i64: 1, 1>, scalar_prefetch = 0 : i64, scratch_operands = 1 : i64, tpu.core_type = #tpu.core_type<tc>, window_params = [{transform_indices = @transform_0, window_bounds = array<i64: 4, 32, 128>}, {transform_indices = @transform_1, window_bounds = array<i64: 4, 32, 128>}]} {
    %c0_i32 = arith.constant 0 : i32
    %0 = arith.cmpi eq, %arg1, %c0_i32 : i32
    %1 = arith.extui %0 : i1 to i32
    %c0_i32_0 = arith.constant 0 : i32
    %2 = arith.cmpi ne, %1, %c0_i32_0 : i32
    scf.if %2 {
      %cst_32 = arith.constant 0.000000e+00 : f32
      %69 = vector.broadcast %cst_32 : f32 to vector<32x128xf32>
      %c0_33 = arith.constant 0 : index
      %c0_34 = arith.constant 0 : index
      %70 = vector.load %arg4[%c0_33, %c0_34] : memref<32x128xf32, #tpu.memory_space<vmem>>, vector<32x128xf32>
      tpu.vector_store %arg4[%c0_33, %c0_34], %69 {strides = array<i32>} : memref<32x128xf32, #tpu.memory_space<vmem>>, vector<32x128xf32>,
    } else {
    }
    %c0 = arith.constant 0 : index
    %c0_1 = arith.constant 0 : index
    %3 = vector.load %arg4[%c0, %c0_1] : memref<32x128xf32, #tpu.memory_space<vmem>>, vector<32x128xf32>
    %c0_i32_2 = arith.constant 0 : i32
    %4 = arith.index_cast %c0_i32_2 : i32 to index
    %c0_3 = arith.constant 0 : index
    %c0_4 = arith.constant 0 : index
    %5 = vector.load %arg2[%4, %c0_3, %c0_4] : memref<4x32x128xf32, #tpu.memory_space<vmem>>, vector<1x32x128xf32>
    %6 = vector.shape_cast %5 : vector<1x32x128xf32> to vector<32x128xf32>
    %7 = arith.addf %3, %6 : vector<32x128xf32>
    %cst = arith.constant 0.000000e+00 : f32
    %cst_5 = arith.constant 4.000000e+00 : f32
    %8 = vector.broadcast %cst : f32 to vector<32x128xf32>
    %9 = arith.maximumf %8, %7 : vector<32x128xf32>
    %10 = vector.broadcast %cst_5 : f32 to vector<32x128xf32>
    %11 = arith.minimumf %10, %9 : vector<32x128xf32>
    %12 = math.roundeven %11 : vector<32x128xf32>
    %13 = arith.index_cast %c0_i32_2 : i32 to index
    %c0_6 = arith.constant 0 : index
    %c0_7 = arith.constant 0 : index
    %14 = vector.load %arg3[%13, %c0_6, %c0_7] : memref<4x32x128xf32, #tpu.memory_space<vmem>>, vector<1x32x128xf32>
    %15 = vector.shape_cast %14 : vector<1x32x128xf32> to vector<32x128xf32>
    %16 = vector.shape_cast %12 : vector<32x128xf32> to vector<1x32x128xf32>
    tpu.vector_store %arg3[%13, %c0_6, %c0_7], %16 {strides = array<i32>} : memref<4x32x128xf32, #tpu.memory_space<vmem>>, vector<1x32x128xf32>,
    %17 = arith.subf %7, %12 : vector<32x128xf32>
    %cst_8 = arith.constant 2.500000e-01 : f32
    %18 = vector.broadcast %cst_8 : f32 to vector<32x128xf32>
    %19 = arith.mulf %17, %18 : vector<32x128xf32>
    %c1_i32 = arith.constant 1 : i32
    %20 = arith.index_cast %c1_i32 : i32 to index
    %c0_9 = arith.constant 0 : index
    %c0_10 = arith.constant 0 : index
    %21 = vector.load %arg2[%20, %c0_9, %c0_10] : memref<4x32x128xf32, #tpu.memory_space<vmem>>, vector<1x32x128xf32>
    %22 = vector.shape_cast %21 : vector<1x32x128xf32> to vector<32x128xf32>
    %23 = arith.addf %19, %22 : vector<32x128xf32>
    %cst_11 = arith.constant 0.000000e+00 : f32
    %cst_12 = arith.constant 4.000000e+00 : f32
    %24 = vector.broadcast %cst_11 : f32 to vector<32x128xf32>
    %25 = arith.maximumf %24, %23 : vector<32x128xf32>
    %26 = vector.broadcast %cst_12 : f32 to vector<32x128xf32>
    %27 = arith.minimumf %26, %25 : vector<32x128xf32>
    %28 = math.roundeven %27 : vector<32x128xf32>
    %29 = arith.index_cast %c1_i32 : i32 to index
    %c0_13 = arith.constant 0 : index
    %c0_14 = arith.constant 0 : index
    %30 = vector.load %arg3[%29, %c0_13, %c0_14] : memref<4x32x128xf32, #tpu.memory_space<vmem>>, vector<1x32x128xf32>
    %31 = vector.shape_cast %30 : vector<1x32x128xf32> to vector<32x128xf32>
    %32 = vector.shape_cast %28 : vector<32x128xf32> to vector<1x32x128xf32>
    tpu.vector_store %arg3[%29, %c0_13, %c0_14], %32 {strides = array<i32>} : memref<4x32x128xf32, #tpu.memory_space<vmem>>, vector<1x32x128xf32>,
    %33 = arith.subf %23, %28 : vector<32x128xf32>
    %cst_15 = arith.constant 2.500000e-01 : f32
    %34 = vector.broadcast %cst_15 : f32 to vector<32x128xf32>
    %35 = arith.mulf %33, %34 : vector<32x128xf32>
    %c2_i32 = arith.constant 2 : i32
    %36 = arith.index_cast %c2_i32 : i32 to index
    %c0_16 = arith.constant 0 : index
    %c0_17 = arith.constant 0 : index
    %37 = vector.load %arg2[%36, %c0_16, %c0_17] : memref<4x32x128xf32, #tpu.memory_space<vmem>>, vector<1x32x128xf32>
    %38 = vector.shape_cast %37 : vector<1x32x128xf32> to vector<32x128xf32>
    %39 = arith.addf %35, %38 : vector<32x128xf32>
    %cst_18 = arith.constant 0.000000e+00 : f32
    %cst_19 = arith.constant 4.000000e+00 : f32
    %40 = vector.broadcast %cst_18 : f32 to vector<32x128xf32>
    %41 = arith.maximumf %40, %39 : vector<32x128xf32>
    %42 = vector.broadcast %cst_19 : f32 to vector<32x128xf32>
    %43 = arith.minimumf %42, %41 : vector<32x128xf32>
    %44 = math.roundeven %43 : vector<32x128xf32>
    %45 = arith.index_cast %c2_i32 : i32 to index
    %c0_20 = arith.constant 0 : index
    %c0_21 = arith.constant 0 : index
    %46 = vector.load %arg3[%45, %c0_20, %c0_21] : memref<4x32x128xf32, #tpu.memory_space<vmem>>, vector<1x32x128xf32>
    %47 = vector.shape_cast %46 : vector<1x32x128xf32> to vector<32x128xf32>
    %48 = vector.shape_cast %44 : vector<32x128xf32> to vector<1x32x128xf32>
    tpu.vector_store %arg3[%45, %c0_20, %c0_21], %48 {strides = array<i32>} : memref<4x32x128xf32, #tpu.memory_space<vmem>>, vector<1x32x128xf32>,
    %49 = arith.subf %39, %44 : vector<32x128xf32>
    %cst_22 = arith.constant 2.500000e-01 : f32
    %50 = vector.broadcast %cst_22 : f32 to vector<32x128xf32>
    %51 = arith.mulf %49, %50 : vector<32x128xf32>
    %c3_i32 = arith.constant 3 : i32
    %52 = arith.index_cast %c3_i32 : i32 to index
    %c0_23 = arith.constant 0 : index
    %c0_24 = arith.constant 0 : index
    %53 = vector.load %arg2[%52, %c0_23, %c0_24] : memref<4x32x128xf32, #tpu.memory_space<vmem>>, vector<1x32x128xf32>
    %54 = vector.shape_cast %53 : vector<1x32x128xf32> to vector<32x128xf32>
    %55 = arith.addf %51, %54 : vector<32x128xf32>
    %cst_25 = arith.constant 0.000000e+00 : f32
    %cst_26 = arith.constant 4.000000e+00 : f32
    %56 = vector.broadcast %cst_25 : f32 to vector<32x128xf32>
    %57 = arith.maximumf %56, %55 : vector<32x128xf32>
    %58 = vector.broadcast %cst_26 : f32 to vector<32x128xf32>
    %59 = arith.minimumf %58, %57 : vector<32x128xf32>
    %60 = math.roundeven %59 : vector<32x128xf32>
    %61 = arith.index_cast %c3_i32 : i32 to index
    %c0_27 = arith.constant 0 : index
    %c0_28 = arith.constant 0 : index
    %62 = vector.load %arg3[%61, %c0_27, %c0_28] : memref<4x32x128xf32, #tpu.memory_space<vmem>>, vector<1x32x128xf32>
    %63 = vector.shape_cast %62 : vector<1x32x128xf32> to vector<32x128xf32>
    %64 = vector.shape_cast %60 : vector<32x128xf32> to vector<1x32x128xf32>
    tpu.vector_store %arg3[%61, %c0_27, %c0_28], %64 {strides = array<i32>} : memref<4x32x128xf32, #tpu.memory_space<vmem>>, vector<1x32x128xf32>,
    %65 = arith.subf %55, %60 : vector<32x128xf32>
    %cst_29 = arith.constant 2.500000e-01 : f32
    %66 = vector.broadcast %cst_29 : f32 to vector<32x128xf32>
    %67 = arith.mulf %65, %66 : vector<32x128xf32>
    %c4_i32 = arith.constant 4 : i32
    %c0_30 = arith.constant 0 : index
    %c0_31 = arith.constant 0 : index
    %68 = vector.load %arg4[%c0_30, %c0_31] : memref<32x128xf32, #tpu.memory_space<vmem>>, vector<32x128xf32>
    tpu.vector_store %arg4[%c0_30, %c0_31], %67 {strides = array<i32>} : memref<32x128xf32, #tpu.memory_space<vmem>>, vector<32x128xf32>,
    return
  }
  func.func @transform_0(%arg0: i32, %arg1: i32) -> (i32, i32, i32) {
    %c0_i32 = arith.constant 0 : i32
    %c0_i32_0 = arith.constant 0 : i32
    return %arg1, %arg0, %c0_i32 : i32, i32, i32
  }
  func.func @transform_1(%arg0: i32, %arg1: i32) -> (i32, i32, i32) {
    %c0_i32 = arith.constant 0 : i32
    %c0_i32_0 = arith.constant 0 : i32
    return %arg1, %arg0, %c0_i32 : i32, i32, i32
  }
}

</mosaic_0001>

<bundles_post_ra>
// kernel: mem_update_forward.1
= control target key start
LH: loop header
LB: loop body
LE: loop exit
PB: predicated region body
PF: predicated region fallthrough
CT: control target
= control target key end

     0   :  { %s426_s0 = inlined_call_operand.vmem [shape: f32[4,32,128], index: 0, kind: input, shape index: {}]   ;;  %s427_s1 = inlined_call_operand.vmem [shape: f32[4,32,128], index: 1, kind: output, shape index: {}]  }
   0x1   :  { %v20_v0 = vld [vmem:[%s426_s0] sm:$0xff]  ;;  %v21_v1 = vld [vmem:[%s426_s0 + $0x8] sm:$0xff]  ;;  %v22_v2 = vld [vmem:[%s426_s0 + $0x10] sm:$0xff] }
   0x2   :  { %v28_v3 = vmax.f32 %v20_v0, 0.0  ;;  %v29_v4 = vmax.f32 %v21_v1, 0.0  ;;  %v30_v5 = vmax.f32 %v22_v2, 0.0  ;;  %v23_v6 = vld [vmem:[%s426_s0 + $0x18] sm:$0xff]  ;;  %v162_v43 = vld [vmem:[%s426_s0 + $0x20] sm:$0xff]  ;;  %v163_v45 = vld [vmem:[%s426_s0 + $0x28] sm:$0xff] }
   0x3   :  { %v31_v7 = vmax.f32 %v23_v6, 0.0  ;;  %v164_v46 = vld [vmem:[%s426_s0 + $0x30] sm:$0xff]  ;;  %v165_v54 = vld [vmem:[%s426_s0 + $0x38] sm:$0xff] }
   0x4   :  { %v32_v8 = vmin.f32 %v28_v3, 4.0  ;;  %v33_v9 = vmin.f32 %v29_v4, 4.0  ;;  %v34_v10 = vmin.f32 %v30_v5, 4.0 }
   0x5   :  { %v35_v14 = vmin.f32 %v31_v7, 4.0 }
   0x6   :  { %v186_v11 = vand.u32 2147483647, %v32_v8  ;;  %v188_v12 = vcvt.f32.s32 %v32_v8  ;;  %v194_v13 = vand.u32 2147483647, %v33_v9  ;;  %v196_v15 = vcvt.f32.s32 %v33_v9 }
   0x7   :  { %v204_v16 = vcvt.f32.s32 %v34_v10  ;;  %v191_v18 = vand.u32 2147483648, %v32_v8  ;;  %v202_v19 = vand.u32 2147483647, %v34_v10  ;;  %v199_v21 = vand.u32 2147483648, %v33_v9 }
   0x8   :  { %v189_v17 = vcvt.s32.f32 %v188_v12  ;;  %v197_v20 = vcvt.s32.f32 %v196_v15  ;;  %v207_v23 = vand.u32 2147483648, %v34_v10  ;;  %vm187_vm0 = vcmp.lt.f32.partialorder %v186_v11, 8388608.0 }
   0x9   :  { %v205_v22 = vcvt.s32.f32 %v204_v16  ;;  %vm336_vm1 = vcmp.lt.f32.partialorder %v194_v13, 8388608.0  ;;  %v212_v26 = vcvt.f32.s32 %v35_v14  ;;  %v210_v29 = vand.u32 2147483647, %v35_v14 }
   0xa   :  { %v190_v24 = vand.u32 2147483647, %v189_v17  ;;  %v198_v27 = vand.u32 2147483647, %v197_v20  ;;  %vm203_vm2 = vcmp.lt.f32.partialorder %v202_v19, 8388608.0  ;;  %v215_v32 = vand.u32 2147483648, %v35_v14 }
   0xb   :  { %v206_v28 = vand.u32 2147483647, %v205_v22  ;;  %v213_v31 = vcvt.s32.f32 %v212_v26  ;;  %vm211_vm3 = vcmp.lt.f32.partialorder %v210_v29, 8388608.0  ;;  %v170_v29 = vld [vmem:[%s426_s0 + $0x40] sm:$0xff] }
   0xc   :  { %v192_v30 = vor.u32 %v191_v18, %v190_v24  ;;  %v200_v33 = vor.u32 %v199_v21, %v198_v27 }
   0xd   :  { %v208_v34 = vor.u32 %v207_v23, %v206_v28  ;;  %v214_v36 = vand.u32 2147483647, %v213_v31 }
   0xe   :  { %v193_v35 = vsel %vm187_vm0, %v192_v30, %v32_v8  ;;  %v201_v38 = vsel %vm336_vm1, %v200_v33, %v33_v9  ;;  %v171_v33 = vld [vmem:[%s426_s0 + $0x48] sm:$0xff] }
   0xf   :  { %40 = vst [vmem:[%s427_s1] sm:$0xff] %v193_v35  ;;  %v44_v37 = vsub.f32 %v20_v0, %v193_v35  ;;  %v209_v39 = vsel %vm203_vm2, %v208_v34, %v34_v10  ;;  %41 = vst [vmem:[%s427_s1 + $0x8] sm:$0xff] %v201_v38  ;;  %v45_v40 = vsub.f32 %v21_v1, %v201_v38  ;;  %v172_v35 = vld [vmem:[%s426_s0 + $0x50] sm:$0xff] }
  0x10   :  { %42 = vst [vmem:[%s427_s1 + $0x10] sm:$0xff] %v209_v39  ;;  %v46_v41 = vsub.f32 %v22_v2, %v209_v39  ;;  %v216_v42 = vor.u32 %v215_v32, %v214_v36 }
  0x11   :  { %v48_v44 = vmul.f32 0.25, %v44_v37  ;;  %v49_v47 = vmul.f32 0.25, %v45_v40 }
  0x12   :  { %v50_v48 = vmul.f32 0.25, %v46_v41  ;;  %v217_v49 = vsel %vm211_vm3, %v216_v42, %v35_v14 }
  0x13   :  { %43 = vst [vmem:[%s427_s1 + $0x18] sm:$0xff] %v217_v49  ;;  %v47_v50 = vsub.f32 %v23_v6, %v217_v49  ;;  %v57_v51 = vadd.f32 %v162_v43, %v48_v44  ;;  %v58_v52 = vadd.f32 %v163_v45, %v49_v47  ;;  %v173_v43 = vld [vmem:[%s426_s0 + $0x58] sm:$0xff] }
  0x14   :  { %v59_v53 = vadd.f32 %v164_v46, %v50_v48 }
  0x15   :  { %v51_v55 = vmul.f32 0.25, %v47_v50  ;;  %v61_v56 = vmax.f32 %v57_v51, 0.0  ;;  %v62_v57 = vmax.f32 %v58_v52, 0.0 }
  0x16   :  { %v63_v58 = vmax.f32 %v59_v53, 0.0 }
  0x17   :  { %v65_v59 = vmin.f32 %v61_v56, 4.0  ;;  %v60_v60 = vadd.f32 %v165_v54, %v51_v55  ;;  %v66_v61 = vmin.f32 %v62_v57, 4.0 }
  0x18   :  { %v67_v62 = vmin.f32 %v63_v58, 4.0 }
  0x19   :  { %v220_v63 = vcvt.f32.s32 %v65_v59  ;;  %v64_v0 = vmax.f32 %v60_v60, 0.0  ;;  %v218_v1 = vand.u32 2147483647, %v65_v59  ;;  %v228_v2 = vcvt.f32.s32 %v66_v61 }
  0x1a   :  { %v223_v4 = vand.u32 2147483648, %v65_v59  ;;  %v226_v5 = vand.u32 2147483647, %v66_v61  ;;  %v236_v6 = vcvt.f32.s32 %v67_v62  ;;  %v231_v8 = vand.u32 2147483648, %v66_v61 }
  0x1b   :  { %v221_v3 = vcvt.s32.f32 %v220_v63  ;;  %v229_v7 = vcvt.s32.f32 %v228_v2  ;;  %v234_v9 = vand.u32 2147483647, %v67_v62  ;;  %v68_v10 = vmin.f32 %v64_v0, 4.0 }
  0x1c   :  { %v237_v12 = vcvt.s32.f32 %v236_v6  ;;  %v239_v13 = vand.u32 2147483648, %v67_v62  ;;  %vm219_vm4 = vcmp.lt.f32.partialorder %v218_v1, 8388608.0  ;;  %vm227_vm5 = vcmp.lt.f32.partialorder %v226_v5, 8388608.0 }
  0x1d   :  { %v222_v11 = vand.u32 2147483647, %v221_v3  ;;  %v230_v14 = vand.u32 2147483647, %v229_v7  ;;  %v244_v15 = vcvt.f32.s32 %v68_v10  ;;  %v242_v18 = vand.u32 2147483647, %v68_v10 }
  0x1e   :  { %v238_v17 = vand.u32 2147483647, %v237_v12  ;;  %vm235_vm6 = vcmp.lt.f32.partialorder %v234_v9, 8388608.0  ;;  %v247_v21 = vand.u32 2147483648, %v68_v10 }
  0x1f   :  { %v224_v16 = vor.u32 %v223_v4, %v222_v11  ;;  %v232_v19 = vor.u32 %v231_v8, %v230_v14  ;;  %v245_v20 = vcvt.s32.f32 %v244_v15  ;;  %vm243_vm7 = vcmp.lt.f32.partialorder %v242_v18, 8388608.0  ;;  %v178_v15 = vld [vmem:[%s426_s0 + $0x60] sm:$0xff] }
  0x20   :  { %v240_v23 = vor.u32 %v239_v13, %v238_v17 }
  0x21   :  { %v225_v22 = vsel %vm219_vm4, %v224_v16, %v65_v59  ;;  %v233_v25 = vsel %vm227_vm5, %v232_v19, %v66_v61  ;;  %v246_v26 = vand.u32 2147483647, %v245_v20  ;;  %v179_v19 = vld [vmem:[%s426_s0 + $0x68] sm:$0xff] }
  0x22   :  { %166 = vst [vmem:[%s427_s1 + $0x20] sm:$0xff] %v225_v22  ;;  %v78_v24 = vsub.f32 %v57_v51, %v225_v22  ;;  %167 = vst [vmem:[%s427_s1 + $0x28] sm:$0xff] %v233_v25  ;;  %v79_v27 = vsub.f32 %v58_v52, %v233_v25  ;;  %v241_v28 = vsel %vm235_vm6, %v240_v23, %v67_v62  ;;  %v180_v23 = vld [vmem:[%s426_s0 + $0x70] sm:$0xff] }
  0x23   :  { %168 = vst [vmem:[%s427_s1 + $0x30] sm:$0xff] %v241_v28  ;;  %v80_v31 = vsub.f32 %v59_v53, %v241_v28  ;;  %v248_v32 = vor.u32 %v247_v21, %v246_v26 }
  0x24   :  { %v82_v30 = vmul.f32 0.25, %v78_v24  ;;  %v83_v34 = vmul.f32 0.25, %v79_v27 }
  0x25   :  { %v84_v36 = vmul.f32 0.25, %v80_v31  ;;  %v249_v37 = vsel %vm243_vm7, %v248_v32, %v68_v10  ;;  %v181_v31 = vld [vmem:[%s426_s0 + $0x78] sm:$0xff] }
  0x26   :  { %v91_v38 = vadd.f32 %v170_v29, %v82_v30  ;;  %169 = vst [vmem:[%s427_s1 + $0x38] sm:$0xff] %v249_v37  ;;  %v81_v39 = vsub.f32 %v60_v60, %v249_v37  ;;  %v92_v40 = vadd.f32 %v171_v33, %v83_v34 }
  0x27   :  { %v93_v42 = vadd.f32 %v172_v35, %v84_v36 }
  0x28   :  { %v95_v41 = vmax.f32 %v91_v38, 0.0  ;;  %v85_v44 = vmul.f32 0.25, %v81_v39  ;;  %v96_v45 = vmax.f32 %v92_v40, 0.0 }
  0x29   :  { %v97_v47 = vmax.f32 %v93_v42, 0.0 }
  0x2a   :  { %v99_v46 = vmin.f32 %v95_v41, 4.0  ;;  %v100_v48 = vmin.f32 %v96_v45, 4.0  ;;  %v94_v49 = vadd.f32 %v173_v43, %v85_v44 }
  0x2b   :  { %v101_v51 = vmin.f32 %v97_v47, 4.0 }
  0x2c   :  { %v252_v50 = vcvt.f32.s32 %v99_v46  ;;  %v250_v52 = vand.u32 2147483647, %v99_v46  ;;  %v260_v53 = vcvt.f32.s32 %v100_v48  ;;  %v98_v54 = vmax.f32 %v94_v49, 0.0 }
  0x2d   :  { %v255_v56 = vand.u32 2147483648, %v99_v46  ;;  %v258_v57 = vand.u32 2147483647, %v100_v48  ;;  %v268_v58 = vcvt.f32.s32 %v101_v51  ;;  %v263_v60 = vand.u32 2147483648, %v100_v48 }
  0x2e   :  { %v253_v55 = vcvt.s32.f32 %v252_v50  ;;  %v261_v59 = vcvt.s32.f32 %v260_v53  ;;  %v266_v61 = vand.u32 2147483647, %v101_v51  ;;  %v102_v62 = vmin.f32 %v98_v54, 4.0 }
  0x2f   :  { %v269_v0 = vcvt.s32.f32 %v268_v58  ;;  %v271_v1 = vand.u32 2147483648, %v101_v51  ;;  %vm251_vm8 = vcmp.lt.f32.partialorder %v250_v52, 8388608.0  ;;  %vm259_vm9 = vcmp.lt.f32.partialorder %v258_v57, 8388608.0 }
  0x30   :  { %v254_v63 = vand.u32 2147483647, %v253_v55  ;;  %v262_v2 = vand.u32 2147483647, %v261_v59  ;;  %v276_v3 = vcvt.f32.s32 %v102_v62  ;;  %v274_v6 = vand.u32 2147483647, %v102_v62 }
  0x31   :  { %v270_v5 = vand.u32 2147483647, %v269_v0  ;;  %vm267_vm10 = vcmp.lt.f32.partialorder %v266_v61, 8388608.0  ;;  %v279_v9 = vand.u32 2147483648, %v102_v62 }
  0x32   :  { %v256_v4 = vor.u32 %v255_v56, %v254_v63  ;;  %v264_v7 = vor.u32 %v263_v60, %v262_v2  ;;  %v277_v8 = vcvt.s32.f32 %v276_v3  ;;  %vm275_vm11 = vcmp.lt.f32.partialorder %v274_v6, 8388608.0 }
  0x33   :  { %v272_v11 = vor.u32 %v271_v1, %v270_v5 }
  0x34   :  { %v257_v10 = vsel %vm251_vm8, %v256_v4, %v99_v46  ;;  %v265_v13 = vsel %vm259_vm9, %v264_v7, %v100_v48  ;;  %v278_v14 = vand.u32 2147483647, %v277_v8 }
  0x35   :  { %174 = vst [vmem:[%s427_s1 + $0x40] sm:$0xff] %v257_v10  ;;  %v112_v12 = vsub.f32 %v91_v38, %v257_v10  ;;  %175 = vst [vmem:[%s427_s1 + $0x48] sm:$0xff] %v265_v13  ;;  %v113_v16 = vsub.f32 %v92_v40, %v265_v13  ;;  %v273_v17 = vsel %vm267_vm10, %v272_v11, %v101_v51 }
  0x36   :  { %176 = vst [vmem:[%s427_s1 + $0x50] sm:$0xff] %v273_v17  ;;  %v114_v20 = vsub.f32 %v93_v42, %v273_v17  ;;  %v280_v21 = vor.u32 %v279_v9, %v278_v14 }
  0x37   :  { %v116_v18 = vmul.f32 0.25, %v112_v12  ;;  %v117_v22 = vmul.f32 0.25, %v113_v16 }
  0x38   :  { %v118_v25 = vmul.f32 0.25, %v114_v20  ;;  %v281_v26 = vsel %vm275_vm11, %v280_v21, %v102_v62 }
  0x39   :  { %v125_v24 = vadd.f32 %v178_v15, %v116_v18  ;;  %v126_v27 = vadd.f32 %v179_v19, %v117_v22  ;;  %177 = vst [vmem:[%s427_s1 + $0x58] sm:$0xff] %v281_v26  ;;  %v115_v28 = vsub.f32 %v94_v49, %v281_v26 }
  0x3a   :  { %v127_v30 = vadd.f32 %v180_v23, %v118_v25 }
  0x3b   :  { %v129_v29 = vmax.f32 %v125_v24, 0.0  ;;  %v130_v32 = vmax.f32 %v126_v27, 0.0  ;;  %v119_v33 = vmul.f32 0.25, %v115_v28 }
  0x3c   :  { %v131_v35 = vmax.f32 %v127_v30, 0.0 }
  0x3d   :  { %v133_v34 = vmin.f32 %v129_v29, 4.0  ;;  %v134_v36 = vmin.f32 %v130_v32, 4.0  ;;  %v128_v37 = vadd.f32 %v181_v31, %v119_v33 }
  0x3e   :  { %v135_v38 = vmin.f32 %v131_v35, 4.0 }
  0x3f   :  { %v284_v39 = vcvt.f32.s32 %v133_v34  ;;  %v132_v40 = vmax.f32 %v128_v37, 0.0  ;;  %v282_v41 = vand.u32 2147483647, %v133_v34  ;;  %v292_v42 = vcvt.f32.s32 %v134_v36 }
  0x40   :  { %v287_v44 = vand.u32 2147483648, %v133_v34  ;;  %v290_v45 = vand.u32 2147483647, %v134_v36  ;;  %v300_v46 = vcvt.f32.s32 %v135_v38  ;;  %v295_v49 = vand.u32 2147483648, %v134_v36 }
  0x41   :  { %v285_v43 = vcvt.s32.f32 %v284_v39  ;;  %v136_v47 = vmin.f32 %v132_v40, 4.0  ;;  %v293_v48 = vcvt.s32.f32 %v292_v42  ;;  %v298_v50 = vand.u32 2147483647, %v135_v38 }
  0x42   :  { %v301_v52 = vcvt.s32.f32 %v300_v46  ;;  %v303_v53 = vand.u32 2147483648, %v135_v38  ;;  %vm283_vm12 = vcmp.lt.f32.partialorder %v282_v41, 8388608.0  ;;  %vm291_vm13 = vcmp.lt.f32.partialorder %v290_v45, 8388608.0 }
  0x43   :  { %v286_v51 = vand.u32 2147483647, %v285_v43  ;;  %v294_v54 = vand.u32 2147483647, %v293_v48  ;;  %v308_v55 = vcvt.f32.s32 %v136_v47  ;;  %v306_v58 = vand.u32 2147483647, %v136_v47 }
  0x44   :  { %v302_v57 = vand.u32 2147483647, %v301_v52  ;;  %vm299_vm14 = vcmp.lt.f32.partialorder %v298_v50, 8388608.0  ;;  %v311_v61 = vand.u32 2147483648, %v136_v47 }
  0x45   :  { %v288_v56 = vor.u32 %v287_v44, %v286_v51  ;;  %v296_v59 = vor.u32 %v295_v49, %v294_v54  ;;  %v309_v60 = vcvt.s32.f32 %v308_v55  ;;  %vm307_vm15 = vcmp.lt.f32.partialorder %v306_v58, 8388608.0 }
  0x46   :  { %v304_v63 = vor.u32 %v303_v53, %v302_v57 }
  0x47   :  { %v289_v62 = vsel %vm283_vm12, %v288_v56, %v133_v34  ;;  %v297_v0 = vsel %vm291_vm13, %v296_v59, %v134_v36  ;;  %v310_v1 = vand.u32 2147483647, %v309_v60 }
  0x48   :  { %182 = vst [vmem:[%s427_s1 + $0x60] sm:$0xff] %v289_v62  ;;  %183 = vst [vmem:[%s427_s1 + $0x68] sm:$0xff] %v297_v0  ;;  %v305_v2 = vsel %vm299_vm14, %v304_v63, %v135_v38 }
  0x49   :  { %184 = vst [vmem:[%s427_s1 + $0x70] sm:$0xff] %v305_v2  ;;  %v312_v3 = vor.u32 %v311_v61, %v310_v1 }
  0x4b   :  { %v313_v4 = vsel %vm307_vm15, %v312_v3, %v136_v47 }
  0x4c   :  { %185 = vst [vmem:[%s427_s1 + $0x78] sm:$0xff] %v313_v4 }

</bundles_post_ra>
